<compile_context>
chip_gen: v7x
topology: tpu7x:2x2x1
jax: 0.10.0
libtpu: 0.0.40
codegen_flags: <defaults>
</compile_context>

<pallas_src>
import jax
import jax.numpy as jnp
from jax import lax
from jax.experimental import pallas as pl
from jax.experimental.pallas import tpu as pltpu

F_IN = 14     # LSTM input_size
H = 128       # LSTM hidden_size
OUT = 1       # Linear output features


def _lstm_recurrence_kernel(preact_ref, whh_ref, wlin_ref, blin_ref,
                            out_ref, hall_ref):
    """Single-invocation LSTM recurrence + batched output projection.

    preact_ref: (T, B, 4H) precomputed x@W_ih^T + b_ih + b_hh, time-major
    whh_ref   : (H, 4H)    W_hh^T
    wlin_ref  : (1, H)     Linear weight row
    blin_ref  : (1, 1)     Linear bias
    out_ref   : (T, B)     per-timestep scalar output
    hall_ref  : (T, B, H)  VMEM scratch holding all hidden states
    """
    T, B, _ = preact_ref.shape

    def step(t, carry):
        h, c = carry
        # gates: (B, 4H), PyTorch gate order [i, f, g, o]
        gates = preact_ref[t] + jnp.dot(h, whh_ref[...],
                                        preferred_element_type=jnp.float32)
        i_g = jax.nn.sigmoid(gates[:, 0 * H:1 * H])
        f_g = jax.nn.sigmoid(gates[:, 1 * H:2 * H])
        g_g = jnp.tanh(gates[:, 2 * H:3 * H])
        o_g = jax.nn.sigmoid(gates[:, 3 * H:4 * H])
        c_new = f_g * c + i_g * g_g
        h_new = o_g * jnp.tanh(c_new)
        hall_ref[t] = h_new
        return (h_new, c_new)

    h0 = jnp.zeros((B, H), jnp.float32)
    c0 = jnp.zeros((B, H), jnp.float32)
    lax.fori_loop(0, T, step, (h0, c0))

    # Batched Linear(128 -> 1) over all timesteps at once:
    # VPU multiply + lane reduce over H, single output write.
    h_all = hall_ref[...]                                     # (T, B, H)
    y = jnp.sum(h_all * wlin_ref[...], axis=-1)               # (T, B)
    out_ref[...] = y + blin_ref[...]                          # broadcast (1,1)


@jax.jit
def market_lstm_forward(x, w_ih, w_hh, b_ih, b_hh, w_lin, b_lin):
    """x: (B, T, F_IN) float32. Returns (B, T, 1) float32."""
    B, T, F = x.shape
    assert F == F_IN

    x = x.astype(jnp.float32)

    # Hoisted input projection (one big matmul, emitted time-major) + fused biases.
    bias = (b_ih + b_hh).astype(jnp.float32)                      # (4H,)
    preact = jnp.einsum('btf,gf->tbg', x,
                        w_ih.astype(jnp.float32)) + bias          # (T, B, 4H)

    whh_t = jnp.transpose(w_hh).astype(jnp.float32)               # (H, 4H)
    wlin_row = w_lin.astype(jnp.float32).reshape(1, H)            # (1, H)
    blin = b_lin.astype(jnp.float32).reshape(1, 1)                # (1, 1)

    out_tb = pl.pallas_call(
        _lstm_recurrence_kernel,
        out_shape=jax.ShapeDtypeStruct((T, B), jnp.float32),
        grid=(1,),
        in_specs=[
            pl.BlockSpec((T, B, 4 * H), lambda i: (0, 0, 0)),   # pre-activations
            pl.BlockSpec((H, 4 * H), lambda i: (0, 0)),         # W_hh^T (full)
            pl.BlockSpec((1, H), lambda i: (0, 0)),             # W_lin row (full)
            pl.BlockSpec((1, 1), lambda i: (0, 0)),             # b_lin
        ],
        out_specs=pl.BlockSpec((T, B), lambda i: (0, 0)),
        scratch_shapes=[
            pltpu.VMEM((T, B, H), jnp.float32),                 # all hidden states
        ],
        compiler_params=pltpu.CompilerParams(
            dimension_semantics=("arbitrary",),
        ),
    )(preact, whh_t, wlin_row, blin)

    return jnp.transpose(out_tb)[:, :, None]                     # (B, T, 1)


def _reference_forward(x, w_ih, w_hh, b_ih, b_hh, w_lin, b_lin):
    """Pure-JAX reference matching torch.nn.LSTM + Linear semantics."""
    B, T, _ = x.shape

    def step(carry, x_t):
        h, c = carry
        gates = x_t @ w_ih.T + h @ w_hh.T + b_ih + b_hh
        i = jax.nn.sigmoid(gates[:, 0 * H:1 * H])
        f = jax.nn.sigmoid(gates[:, 1 * H:2 * H])
        g = jnp.tanh(gates[:, 2 * H:3 * H])
        o = jax.nn.sigmoid(gates[:, 3 * H:4 * H])
        c = f * c + i * g
        h = o * jnp.tanh(c)
        y = h @ w_lin.T + b_lin
        return (h, c), y

    h0 = jnp.zeros((B, H), jnp.float32)
    c0 = jnp.zeros((B, H), jnp.float32)
    _, ys = lax.scan(step, (h0, c0), jnp.transpose(x, (1, 0, 2)))
    return jnp.transpose(ys, (1, 0, 2))


if __name__ == "__main__":
    key = jax.random.PRNGKey(0)
    kx, k1, k2, k3, k4, k5, k6 = jax.random.split(key, 7)

    B, T = 2, 8
    x = jax.random.normal(kx, (B, T, F_IN), dtype=jnp.float32)

    # Deterministic parameter init (uniform(-1/sqrt(H), 1/sqrt(H)), like PyTorch).
    s = 1.0 / jnp.sqrt(jnp.float32(H))
    w_ih = jax.random.uniform(k1, (4 * H, F_IN), jnp.float32, -s, s)
    w_hh = jax.random.uniform(k2, (4 * H, H), jnp.float32, -s, s)
    b_ih = jax.random.uniform(k3, (4 * H,), jnp.float32, -s, s)
    b_hh = jax.random.uniform(k4, (4 * H,), jnp.float32, -s, s)
    w_lin = jax.random.uniform(k5, (OUT, H), jnp.float32, -s, s)
    b_lin = jax.random.uniform(k6, (OUT,), jnp.float32, -s, s)

    out = market_lstm_forward(x, w_ih, w_hh, b_ih, b_hh, w_lin, b_lin)
    out = jax.block_until_ready(out)

    ref = _reference_forward(x, w_ih, w_hh, b_ih, b_hh, w_lin, b_lin)
    assert out.shape == (B, T, OUT)
    assert jnp.allclose(out, ref, atol=1e-4, rtol=1e-4), "mismatch vs reference"

    print("KERNEL_OK")
</pallas_src>

<mosaic_0001>
module attributes {stable_mosaic.version = 11 : i64} {
  func.func @_lstm_recurrence_kernel(%arg0: i32, %arg1: memref<8x2x512xf32, #tpu.memory_space<vmem>>, %arg2: memref<128x512xf32, #tpu.memory_space<vmem>>, %arg3: memref<1x128xf32, #tpu.memory_space<vmem>>, %arg4: memref<1x1xf32, #tpu.memory_space<vmem>>, %arg5: memref<8x2xf32, #tpu.memory_space<vmem>>, %arg6: memref<8x2x128xf32, #tpu.memory_space<vmem>>) attributes {dimension_semantics = [#tpu.dimension_semantics<arbitrary>], iteration_bounds = array<i64: 1>, scalar_prefetch = 0 : i64, scratch_operands = 1 : i64, tpu.core_type = #tpu.core_type<tc>, window_params = [{pipeline_mode = #tpu.pipeline_mode<synchronous>, transform_indices = @transform_0, window_bounds = array<i64: 8, 2, 512>}, {pipeline_mode = #tpu.pipeline_mode<synchronous>, transform_indices = @transform_1, window_bounds = array<i64: 128, 512>}, {pipeline_mode = #tpu.pipeline_mode<synchronous>, transform_indices = @transform_2, window_bounds = array<i64: 1, 128>}, {pipeline_mode = #tpu.pipeline_mode<synchronous>, transform_indices = @transform_3, window_bounds = array<i64: 1, 1>}, {pipeline_mode = #tpu.pipeline_mode<synchronous>, transform_indices = @transform_4, window_bounds = array<i64: 8, 2>}]} {
    %cst = arith.constant 0.000000e+00 : f32
    %0 = vector.broadcast %cst : f32 to vector<2x128xf32>
    %cst_0 = arith.constant 0.000000e+00 : f32
    %1 = vector.broadcast %cst_0 : f32 to vector<2x128xf32>
    %c0_i32 = arith.constant 0 : i32
    %c8_i32 = arith.constant 8 : i32
    %2 = arith.addi %c0_i32, %c8_i32 : i32
    %c1_i32 = arith.constant 1 : i32
    %3:2 = scf.for %arg7 = %c0_i32 to %2 step %c1_i32 iter_args(%arg8 = %0, %arg9 = %1) -> (vector<2x128xf32>, vector<2x128xf32>)  : i32 {
      %14 = arith.index_cast %arg7 : i32 to index
      %c0_11 = arith.constant 0 : index
      %c0_12 = arith.constant 0 : index
      %15 = vector.load %arg1[%14, %c0_11, %c0_12] : memref<8x2x512xf32, #tpu.memory_space<vmem>>, vector<1x2x512xf32>
      %16 = vector.shape_cast %15 : vector<1x2x512xf32> to vector<2x512xf32>
      %c0_13 = arith.constant 0 : index
      %c0_14 = arith.constant 0 : index
      %17 = vector.load %arg2[%c0_13, %c0_14] : memref<128x512xf32, #tpu.memory_space<vmem>>, vector<128x512xf32>
      %cst_15 = arith.constant dense<0.000000e+00> : vector<2x512xf32>
      %18 = tpu.matmul %arg8, %17, %cst_15 {dimension_numbers = #tpu.dot_dimension_numbers<[1], [0], [0], [1], [0, 0, 1, 1], [], []>} : vector<2x128xf32>, vector<128x512xf32>, vector<2x512xf32> -> vector<2x512xf32>
      %19 = arith.addf %16, %18 : vector<2x512xf32>
      %20 = vector.extract_strided_slice %19 {offsets = [0, 0], sizes = [2, 128], strides = [1, 1]} : vector<2x512xf32> to vector<2x128xf32>
      %21 = arith.negf %20 : vector<2x128xf32>
      %22 = math.exp %21 : vector<2x128xf32>
      %cst_16 = arith.constant 1.000000e+00 : f32
      %23 = vector.broadcast %cst_16 : f32 to vector<2x128xf32>
      %24 = arith.addf %23, %22 : vector<2x128xf32>
      %25 = arith.divf %23, %24 : vector<2x128xf32>
      %26 = vector.extract_strided_slice %19 {offsets = [0, 128], sizes = [2, 128], strides = [1, 1]} : vector<2x512xf32> to vector<2x128xf32>
      %27 = arith.negf %26 : vector<2x128xf32>
      %28 = math.exp %27 : vector<2x128xf32>
      %cst_17 = arith.constant 1.000000e+00 : f32
      %29 = vector.broadcast %cst_17 : f32 to vector<2x128xf32>
      %30 = arith.addf %29, %28 : vector<2x128xf32>
      %31 = arith.divf %29, %30 : vector<2x128xf32>
      %32 = vector.extract_strided_slice %19 {offsets = [0, 256], sizes = [2, 128], strides = [1, 1]} : vector<2x512xf32> to vector<2x128xf32>
      %33 = math.tanh %32 : vector<2x128xf32>
      %34 = vector.extract_strided_slice %19 {offsets = [0, 384], sizes = [2, 128], strides = [1, 1]} : vector<2x512xf32> to vector<2x128xf32>
      %35 = arith.negf %34 : vector<2x128xf32>
      %36 = math.exp %35 : vector<2x128xf32>
      %cst_18 = arith.constant 1.000000e+00 : f32
      %37 = vector.broadcast %cst_18 : f32 to vector<2x128xf32>
      %38 = arith.addf %37, %36 : vector<2x128xf32>
      %39 = arith.divf %37, %38 : vector<2x128xf32>
      %40 = arith.mulf %31, %arg9 : vector<2x128xf32>
      %41 = arith.mulf %25, %33 : vector<2x128xf32>
      %42 = arith.addf %40, %41 : vector<2x128xf32>
      %43 = math.tanh %42 : vector<2x128xf32>
      %44 = arith.mulf %39, %43 : vector<2x128xf32>
      %45 = arith.index_cast %arg7 : i32 to index
      %c0_19 = arith.constant 0 : index
      %c0_20 = arith.constant 0 : index
      %46 = vector.load %arg6[%45, %c0_19, %c0_20] : memref<8x2x128xf32, #tpu.memory_space<vmem>>, vector<1x2x128xf32>
      %47 = vector.shape_cast %46 : vector<1x2x128xf32> to vector<2x128xf32>
      %48 = vector.shape_cast %44 : vector<2x128xf32> to vector<1x2x128xf32>
      tpu.vector_store %arg6[%45, %c0_19, %c0_20], %48 {strides = array<i32>} : memref<8x2x128xf32, #tpu.memory_space<vmem>>, vector<1x2x128xf32>,
      scf.yield %44, %42 : vector<2x128xf32>, vector<2x128xf32>
    }
    %c8_i32_1 = arith.constant 8 : i32
    %c0 = arith.constant 0 : index
    %c0_2 = arith.constant 0 : index
    %c0_3 = arith.constant 0 : index
    %4 = vector.load %arg6[%c0, %c0_2, %c0_3] : memref<8x2x128xf32, #tpu.memory_space<vmem>>, vector<8x2x128xf32>
    %c0_4 = arith.constant 0 : index
    %c0_5 = arith.constant 0 : index
    %5 = vector.load %arg3[%c0_4, %c0_5] : memref<1x128xf32, #tpu.memory_space<vmem>>, vector<1x128xf32>
    %6 = vector.shape_cast %5 : vector<1x128xf32> to vector<1x1x128xf32>
    %7 = vector.broadcast %6 : vector<1x1x128xf32> to vector<8x2x128xf32>
    %8 = arith.mulf %4, %7 : vector<8x2x128xf32>
    %cst_6 = arith.constant dense<0.000000e+00> : vector<8x2xf32>
    %9 = vector.multi_reduction <add>, %8, %cst_6 [2] : vector<8x2x128xf32> to vector<8x2xf32>
    %c0_7 = arith.constant 0 : index
    %c0_8 = arith.constant 0 : index
    %10 = vector.load %arg4[%c0_7, %c0_8] : memref<1x1xf32, #tpu.memory_space<vmem>>, vector<1x1xf32>
    %11 = vector.broadcast %10 : vector<1x1xf32> to vector<8x2xf32>
    %12 = arith.addf %9, %11 : vector<8x2xf32>
    %c0_9 = arith.constant 0 : index
    %c0_10 = arith.constant 0 : index
    %13 = vector.load %arg5[%c0_9, %c0_10] : memref<8x2xf32, #tpu.memory_space<vmem>>, vector<8x2xf32>
    tpu.vector_store %arg5[%c0_9, %c0_10], %12 {strides = array<i32>} : memref<8x2xf32, #tpu.memory_space<vmem>>, vector<8x2xf32>,
    return
  }
  func.func @transform_0(%arg0: i32) -> (i32, i32, i32) {
    %c0_i32 = arith.constant 0 : i32
    %c0_i32_0 = arith.constant 0 : i32
    %c0_i32_1 = arith.constant 0 : i32
    %c0_i32_2 = arith.constant 0 : i32
    return %c0_i32, %c0_i32_0, %c0_i32_1 : i32, i32, i32
  }
  func.func @transform_1(%arg0: i32) -> (i32, i32) {
    %c0_i32 = arith.constant 0 : i32
    %c0_i32_0 = arith.constant 0 : i32
    %c0_i32_1 = arith.constant 0 : i32
    return %c0_i32, %c0_i32_0 : i32, i32
  }
  func.func @transform_2(%arg0: i32) -> (i32, i32) {
    %c0_i32 = arith.constant 0 : i32
    %c0_i32_0 = arith.constant 0 : i32
    %c0_i32_1 = arith.constant 0 : i32
    return %c0_i32, %c0_i32_0 : i32, i32
  }
  func.func @transform_3(%arg0: i32) -> (i32, i32) {
    %c0_i32 = arith.constant 0 : i32
    %c0_i32_0 = arith.constant 0 : i32
    %c0_i32_1 = arith.constant 0 : i32
    return %c0_i32, %c0_i32_0 : i32, i32
  }
  func.func @transform_4(%arg0: i32) -> (i32, i32) {
    %c0_i32 = arith.constant 0 : i32
    %c0_i32_0 = arith.constant 0 : i32
    %c0_i32_1 = arith.constant 0 : i32
    return %c0_i32, %c0_i32_0 : i32, i32
  }
}

</mosaic_0001>

<bundles_post_ra>
// kernel: market_lstm_forward.1
= control target key start
LH: loop header
LB: loop body
LE: loop exit
PB: predicated region body
PF: predicated region fallthrough
CT: control target
= control target key end

     0   :  { %v610_v1 = vmov 0.0   ;;  %v612_v2 = vmov 0.0   ;;  %s614_s17 = smov 0   ;;  %s852_s0 = inlined_call_operand.vmem [shape: f32[8,2,512], index: 0, kind: input, shape index: {}]   ;;  %s853_s1 = inlined_call_operand.vmem [shape: f32[128,512], index: 1, kind: input, shape index: {}]   ;;  %s854_s2 = inlined_call_operand.vmem [shape: f32[1,128], index: 2, kind: input, shape index: {}]   ;;  %s855_s3 = inlined_call_operand.<no memory space> [shape: f32[1,1], index: 3, kind: input, shape index: {}]   ;;  %s856_s4 = inlined_call_operand.vmem [shape: f32[8,2], index: 4, kind: output, shape index: {}]  }
   0x1   :  { %v9_v0 = vstv %s855_s3 }
   0x2   :  { %10 = vst [vmem:[#allocation3] sm:$0x1] %v9_v0 }
   0x3 LB: > { %v32_v3 = vld [vmem:[%s853_s1 + $0x8] sm:$0xff]  ;;  %v34_v5 = vld [vmem:[%s853_s1 + $0x18] sm:$0xff]  ;;  %v31_v8 = vld [vmem:[%s853_s1] sm:$0xff]  ;;  %v579_v10 = vmov 0.0   ;;  %s446_s15 = sshll.u32 %s577_s17, 3  ;;  %s443_s19 = sshll.u32 %s577_s17, 1  ;;  %s577_s17 = sphi %s614_s17, %s24_s17   ;;  %v573_v2 = vphi %v612_v2, %v290_v2   ;;  %v569_v1 = vphi %v610_v1, %v288_v1  }
   0x4   : > { %v36_v4 = vld [vmem:[%s853_s1 + $0x28] sm:$0xff]  ;;  %v38_v7 = vld [vmem:[%s853_s1 + $0x38] sm:$0xff]  ;;  %v35_v9 = vld [vmem:[%s853_s1 + $0x20] sm:$0xff]  ;;  %159 = vmatprep.mubr.f32.mxu0 %v579_v10  ;;  %230 = vmatprep.mubr.f32.mxu1 %v579_v10  ;;  %s29_s3 = scalar_lea.vmem %s852_s0, %s446_s15  ;;  %s292_s20 = scalar_lea.vmem [#allocation2], %s443_s19 }
   0x5   : > { %v447_v6 = vpack.c.bf16 %v36_v4, %v32_v3  ;;  %v479_v11 = vpack.c.bf16 %v38_v7, %v34_v5  ;;  %v449_v12 = vpack.c.bf16 %v35_v9, %v31_v8  ;;  %v33_v13 = vld [vmem:[%s853_s1 + $0x10] sm:$0xff]  ;;  %v40_v15 = vld [vmem:[%s853_s1 + $0x48] sm:$0xff]  ;;  %v42_v18 = vld [vmem:[%s853_s1 + $0x58] sm:$0xff]  ;;  %s24_s17 = sadd.s32 1, %s577_s17  }
   0x6   : > { %v37_v14 = vld [vmem:[%s853_s1 + $0x30] sm:$0xff]  ;;  %v44_v17 = vld [vmem:[%s853_s1 + $0x68] sm:$0xff]  ;;  %v46_v19 = vld [vmem:[%s853_s1 + $0x78] sm:$0xff]  ;;  %p21_p0 = scmp.ge.s32.totalorder %s24_s17, 8  }
   0x7   : > { %448 = vmatprep.subr.bf16.mxu0 %v447_v6  ;;  %v481_v16 = vpack.c.bf16 %v37_v14, %v33_v13  ;;  %480 = vmatprep.subr.bf16.mxu1 %v479_v11  ;;  %v451_v20 = vpack.c.bf16 %v44_v17, %v40_v15  ;;  %v483_v21 = vpack.c.bf16 %v46_v19, %v42_v18  ;;  %v39_v22 = vld [vmem:[%s853_s1 + $0x40] sm:$0xff]  ;;  %v41_v24 = vld [vmem:[%s853_s1 + $0x50] sm:$0xff]  ;;  %v48_v27 = vld [vmem:[%s853_s1 + $0x88] sm:$0xff]  ;;  %vm317_vm0 = vcmask (%p21_p0), 1041408  }
   0x8   : > { %450 = vmatpush1.bf16.msra.mxu0 %v449_v12  ;;  %v43_v23 = vld [vmem:[%s853_s1 + $0x60] sm:$0xff]  ;;  %v45_v26 = vld [vmem:[%s853_s1 + $0x70] sm:$0xff]  ;;  %v52_v28 = vld [vmem:[%s853_s1 + $0xa8] sm:$0xff]  ;;  %vm402_vm1 = vcmask (%p21_p0), 1041409   ;;  %vm404_vm2 = vcmask (%p21_p0), 1042434   ;;  %vm406_vm3 = vcmask (%p21_p0), 1043459  }
   0x9   : > { %482 = vmatpush1.bf16.msra.mxu1 %v481_v16  ;;  %v453_v25 = vpack.c.bf16 %v43_v23, %v39_v22  ;;  %452 = vmatprep.subr.bf16.mxu0 %v451_v20  ;;  %v485_v29 = vpack.c.bf16 %v45_v26, %v41_v24  ;;  %v455_v30 = vpack.c.bf16 %v52_v28, %v48_v27  ;;  %v50_v31 = vld [vmem:[%s853_s1 + $0x98] sm:$0xff]  ;;  %v47_v33 = vld [vmem:[%s853_s1 + $0x80] sm:$0xff]  ;;  %v49_v36 = vld [vmem:[%s853_s1 + $0x90] sm:$0xff]  ;;  %vm408_vm4 = vcmask (%p21_p0), 1044484  }
   0xa   : > { %484 = vmatprep.subr.bf16.mxu1 %v483_v21  ;;  %v54_v32 = vld [vmem:[%s853_s1 + $0xb8] sm:$0xff]  ;;  %v51_v35 = vld [vmem:[%s853_s1 + $0xa0] sm:$0xff]  ;;  %v53_v37 = vld [vmem:[%s853_s1 + $0xb0] sm:$0xff]  ;;  %vm410_vm5 = vcmask (%p21_p0), 1045509   ;;  %vm412_vm6 = vcmask (%p21_p0), 1046534   ;;  %vm414_vm7 = vcmask (%p21_p0), 1047559  }
   0xb   : > { %v487_v34 = vpack.c.bf16 %v54_v32, %v50_v31  ;;  %v457_v38 = vpack.c.bf16 %v51_v35, %v47_v33  ;;  %v56_v39 = vld [vmem:[%s853_s1 + $0xc8] sm:$0xff]  ;;  %v58_v41 = vld [vmem:[%s853_s1 + $0xd8] sm:$0xff]  ;;  %v489_v42 = vpack.c.bf16 %v53_v37, %v49_v36  ;;  %v55_v45 = vld [vmem:[%s853_s1 + $0xc0] sm:$0xff]  ;;  %vm417_vm8 = vcmask (%p21_p0), 15360  }
   0xc   : > { %454 = vmatpush1.bf16.msra.mxu0 %v453_v25  ;;  %v60_v40 = vld [vmem:[%s853_s1 + $0xe8] sm:$0xff]  ;;  %v62_v44 = vld [vmem:[%s853_s1 + $0xf8] sm:$0xff]  ;;  %v59_v46 = vld [vmem:[%s853_s1 + $0xe0] sm:$0xff] }
   0xd   : > { %486 = vmatpush1.bf16.msra.mxu1 %v485_v29  ;;  %456 = vmatprep.subr.bf16.mxu0 %v455_v30  ;;  %v459_v43 = vpack.c.bf16 %v60_v40, %v56_v39  ;;  %v491_v47 = vpack.c.bf16 %v62_v44, %v58_v41  ;;  %v57_v48 = vld [vmem:[%s853_s1 + $0xd0] sm:$0xff]  ;;  %v64_v50 = vld [vmem:[%s853_s1 + $0x108] sm:$0xff]  ;;  %v66_v52 = vld [vmem:[%s853_s1 + $0x118] sm:$0xff]  ;;  %v461_v54 = vpack.c.bf16 %v59_v46, %v55_v45  ;;  %v246_v40 = vlaneseq }
   0xe   : > { %488 = vmatprep.subr.bf16.mxu1 %v487_v34  ;;  %v61_v49 = vld [vmem:[%s853_s1 + $0xf0] sm:$0xff]  ;;  %v68_v51 = vld [vmem:[%s853_s1 + $0x128] sm:$0xff]  ;;  %v70_v53 = vld [vmem:[%s853_s1 + $0x138] sm:$0xff] }
   0xf   : > { %v493_v55 = vpack.c.bf16 %v61_v49, %v57_v48  ;;  %v463_v56 = vpack.c.bf16 %v68_v51, %v64_v50  ;;  %v63_v57 = vld [vmem:[%s853_s1 + $0x100] sm:$0xff]  ;;  %v65_v59 = vld [vmem:[%s853_s1 + $0x110] sm:$0xff]  ;;  %v495_v60 = vpack.c.bf16 %v70_v53, %v66_v52  ;;  %v72_v62 = vld [vmem:[%s853_s1 + $0x148] sm:$0xff] }
  0x10   : > { %458 = vmatpush1.bf16.msra.mxu0 %v457_v38  ;;  %v67_v58 = vld [vmem:[%s853_s1 + $0x120] sm:$0xff]  ;;  %v69_v61 = vld [vmem:[%s853_s1 + $0x130] sm:$0xff]  ;;  %v76_v63 = vld [vmem:[%s853_s1 + $0x168] sm:$0xff]  ;;  %v580_v38 = vmov 1983009808  }
  0x11   : > { %490 = vmatpush1.bf16.msra.mxu1 %v489_v42  ;;  %460 = vmatprep.subr.bf16.mxu0 %v459_v43  ;;  %v74_v0 = vld [vmem:[%s853_s1 + $0x158] sm:$0xff]  ;;  %v465_v4 = vpack.c.bf16 %v67_v58, %v63_v57  ;;  %v497_v5 = vpack.c.bf16 %v69_v61, %v65_v59  ;;  %v467_v6 = vpack.c.bf16 %v76_v63, %v72_v62  ;;  %v71_v7 = vld [vmem:[%s853_s1 + $0x140] sm:$0xff]  ;;  %v73_v9 = vld [vmem:[%s853_s1 + $0x150] sm:$0xff]  ;;  %v244_v39 = vunpack.c.l.s4 %v580_v38 }
  0x12   : > { %492 = vmatprep.subr.bf16.mxu1 %v491_v47  ;;  %v78_v3 = vld [vmem:[%s853_s1 + $0x178] sm:$0xff]  ;;  %v75_v8 = vld [vmem:[%s853_s1 + $0x160] sm:$0xff]  ;;  %v77_v11 = vld [vmem:[%s853_s1 + $0x170] sm:$0xff]  ;;  %v820_v42 = vshrl.u32 %v246_v40, 7 }
  0x13   : > { %v499_v10 = vpack.c.bf16 %v78_v3, %v74_v0  ;;  %v80_v12 = vld [vmem:[%s853_s1 + $0x188] sm:$0xff]  ;;  %v82_v14 = vld [vmem:[%s853_s1 + $0x198] sm:$0xff]  ;;  %v469_v16 = vpack.c.bf16 %v75_v8, %v71_v7  ;;  %v501_v17 = vpack.c.bf16 %v77_v11, %v73_v9  ;;  %v79_v19 = vld [vmem:[%s853_s1 + $0x180] sm:$0xff]  ;;  %v245_v41 = vunpack.c.0.s8 %v244_v39 }
  0x14   : > { %462 = vmatpush1.bf16.msra.mxu0 %v461_v54  ;;  %v84_v13 = vld [vmem:[%s853_s1 + $0x1a8] sm:$0xff]  ;;  %v86_v15 = vld [vmem:[%s853_s1 + $0x1b8] sm:$0xff]  ;;  %v83_v20 = vld [vmem:[%s853_s1 + $0x1a0] sm:$0xff] }
  0x15   : > { %494 = vmatpush1.bf16.msra.mxu1 %v493_v55  ;;  %464 = vmatprep.subr.bf16.mxu0 %v463_v56  ;;  %v471_v18 = vpack.c.bf16 %v84_v13, %v80_v12  ;;  %v81_v21 = vld [vmem:[%s853_s1 + $0x190] sm:$0xff]  ;;  %v503_v22 = vpack.c.bf16 %v86_v15, %v82_v14  ;;  %v88_v24 = vld [vmem:[%s853_s1 + $0x1c8] sm:$0xff]  ;;  %v90_v26 = vld [vmem:[%s853_s1 + $0x1d8] sm:$0xff]  ;;  %v473_v28 = vpack.c.bf16 %v83_v20, %v79_v19 }
  0x16   : > { %496 = vmatprep.subr.bf16.mxu1 %v495_v60  ;;  %v85_v23 = vld [vmem:[%s853_s1 + $0x1b0] sm:$0xff]  ;;  %v92_v25 = vld [vmem:[%s853_s1 + $0x1e8] sm:$0xff]  ;;  %v94_v27 = vld [vmem:[%s853_s1 + $0x1f8] sm:$0xff]  ;;  %v248_v44 = vsub.s32 %v245_v41, %v820_v42 }
  0x17   : > { %v505_v29 = vpack.c.bf16 %v85_v23, %v81_v21  ;;  %v475_v30 = vpack.c.bf16 %v92_v25, %v88_v24  ;;  %v87_v31 = vld [vmem:[%s853_s1 + $0x1c0] sm:$0xff]  ;;  %v507_v33 = vpack.c.bf16 %v94_v27, %v90_v26  ;;  %v89_v34 = vld [vmem:[%s853_s1 + $0x1d0] sm:$0xff] }
  0x18   : > { %466 = vmatpush1.bf16.msra.mxu0 %v465_v4  ;;  %v91_v32 = vld [vmem:[%s853_s1 + $0x1e0] sm:$0xff]  ;;  %v93_v35 = vld [vmem:[%s853_s1 + $0x1f0] sm:$0xff] }
  0x19   : > { %498 = vmatpush1.bf16.msra.mxu1 %v497_v5  ;;  %468 = vmatprep.subr.bf16.mxu0 %v467_v6  ;;  %v477_v36 = vpack.c.bf16 %v91_v32, %v87_v31  ;;  %v509_v37 = vpack.c.bf16 %v93_v35, %v89_v34  ;;  %v30_v51 = vld [vmem:[%s29_s3] sm:$0xff] }
  0x1a   : > { %500 = vmatprep.subr.bf16.mxu1 %v499_v10  ;;  %v444_v12 = vld [vmem:[%s854_s2] ss:$0 sm:$0xff] (%p21_p0) }
  0x1c   : > { %470 = vmatpush1.bf16.msra.mxu0 %v469_v16  ;;  %v581_v16 = vmov (%p21_p0), 0  }
  0x1d   : > { %502 = vmatpush1.bf16.msra.mxu1 %v501_v17  ;;  %472 = vmatprep.subr.bf16.mxu0 %v471_v18 }
  0x1e   : > { %504 = vmatprep.subr.bf16.mxu1 %v503_v22  ;;  %554 = vset.pattern.permute.xlu0 (%p21_p0), %v581_v16 }
  0x20   : > { %474 = vmatpush1.bf16.msra.mxu0 %v473_v28 }
  0x21   : > { %506 = vmatpush1.bf16.msra.mxu1 %v505_v29  ;;  %476 = vmatprep.subr.bf16.mxu0 %v475_v30 }
  0x22   : > { %508 = vmatprep.subr.bf16.mxu1 %v507_v33 }
  0x24   : > { %478 = vmatpush1.bf16.msra.mxu0 %v477_v36  ;;  %v445_v36 = vld [vmem:[#allocation3] ss:$0 sm:$0xff] (%p21_p0) }
  0x25   : > { %510 = vmatpush1.bf16.msra.mxu1 %v509_v37 }
  0x27   : > { %160 = vmatmul.mubr.f32.vlgmr.msra.gmra.mrb[0].mxu0 %v573_v2 }
  0x28   : > { %231 = vmatmul.mubr.f32.vlgmr.msra.gmra.mrb[0].mxu1 %v573_v2 }
  0xfa   : > { %v161_v43 = vpop.f32.mrb[0].mxu0 }
  0xfb   : > { %v232_v45 = vpop.f32.mrb[0].mxu1  ;;  %v163_v46 = vpop.f32.mrb[1].mxu0 }
  0xfc   : > { %v241_v47 = vcombine.low %v161_v43, %v163_v46  ;;  %v234_v48 = vpop.f32.mrb[1].mxu1 }
  0xfd   : > { %v242_v2 = vcombine.low %v232_v45, %v234_v48 }
  0xfe   : > { %v249_v49 = vrot.slane %v241_v47, %v248_v44 }
  0xff   : > { %v256_v50 = vrot.slane %v242_v2, %v248_v44  ;;  %v369_v44 = vand.u32 (%p21_p0), 127, %v246_v40 }
 0x101   : > { %v257_v52 = vcombine.low %v249_v49, %v256_v50  ;;  %v372_v47 = vsub.s32 (%p21_p0), %v369_v44, %v820_v42 }
 0x103   : > { %v259_v53 = vadd.f32 %v257_v52, %v30_v51 }
 0x105   : > { %v440_v54 = vmul.f32 -1.442695, %v259_v53  ;;  %v267_v55 = vrot.slane %v259_v53, 2  ;;  %v278_v57 = vrot.slane %v259_v53, 6  ;;  %v275_v60 = vrot.slane %v259_v53, 4 }
 0x107   : > { %538 = vpow2.f32 %v440_v54  ;;  %v441_v56 = vmul.f32 -1.442695, %v267_v55  ;;  %v442_v58 = vmul.f32 -1.442695, %v278_v57 }
 0x109   : > { %540 = vpow2.f32 %v441_v56 }
 0x10a   : > { %542 = vpow2.f32 %v442_v58 }
 0x111   : > { %v539_v59 = vpop.eup %538 }
 0x112   : > { %v263_v61 = vadd.f32 1.0, %v539_v59 }
 0x113   : > { %v541_v62 = vpop.eup %540 }
 0x114   : > { %544 = vrcp.f32 %v263_v61  ;;  %v272_v63 = vadd.f32 1.0, %v541_v62  ;;  %v543_v0 = vpop.eup %542 }
 0x115   : > { %546 = vtanh.f32 %v275_v60  ;;  %v283_v6 = vadd.f32 1.0, %v543_v0 }
 0x116   : > { %548 = vrcp.f32 %v272_v63 }
 0x117   : > { %550 = vrcp.f32 %v283_v6 }
 0x11e   : > { %v545_v3 = vpop.eup %544 }
 0x11f   : > { %v547_v4 = vpop.eup %546 }
 0x120   : > { %v549_v5 = vpop.eup %548  ;;  %v287_v8 = vmul.f32 %v547_v4, %v545_v3 }
 0x121   : > { %v286_v7 = vmul.f32 %v569_v1, %v549_v5  ;;  %v551_v9 = vpop.eup %550 }
 0x123   : > { %v288_v1 = vadd.f32 %v287_v8, %v286_v7  }
 0x125   : > { %552 = vtanh.f32 %v288_v1 }
 0x12c   :  { %23 = sbr.rel (!%p21_p0) target bundleno = 3 (0x3), region = 45 }
 0x12f   : > { %v553_v10 = vpop.eup %552 }
 0x130   : > { %v290_v2 = vmul.f32 %v553_v10, %v551_v9  }
 0x132   : > { %293 = vst [vmem:[%s292_s20] sm:$0x3] %v290_v2 }
 0x139   :  { %v294_v11 = vld [vmem:[#allocation2] sm:$0x3]  ;;  %v295_v14 = vld [vmem:[#allocation2 + $0x2] sm:$0x3]  ;;  %v296_v15 = vld [vmem:[#allocation2 + $0x4] sm:$0x3] }
 0x13a   :  { %v309_v13 = vmul.f32 %v444_v12, %v294_v11  ;;  %v310_v17 = vmul.f32 %v444_v12, %v295_v14  ;;  %v311_v18 = vmul.f32 %v444_v12, %v296_v15  ;;  %v298_v19 = vld [vmem:[#allocation2 + $0x8] sm:$0x3]  ;;  %v297_v20 = vld [vmem:[#allocation2 + $0x6] sm:$0x3]  ;;  %v299_v23 = vld [vmem:[#allocation2 + $0xa] sm:$0x3] }
 0x13b   :  { %v312_v22 = vmul.f32 %v444_v12, %v297_v20  ;;  %v313_v25 = vmul.f32 %v444_v12, %v298_v19  ;;  %v300_v27 = vld [vmem:[#allocation2 + $0xc] sm:$0x3]  ;;  %v314_v28 = vmul.f32 %v444_v12, %v299_v23  ;;  %v301_v29 = vld [vmem:[#allocation2 + $0xe] sm:$0x3] }
 0x13c   :  { %v318_v21 = vsel %vm317_vm0, %v309_v13, 0.0  ;;  %v324_v1 = vsel %vm317_vm0, %v311_v18, 0.0  ;;  %v321_v24 = vsel %vm317_vm0, %v310_v17, 0.0  ;;  %v315_v31 = vmul.f32 %v444_v12, %v300_v27 }
 0x13d   :  { %319 = vadd.xlane.f32.xlu0 %v318_v21  ;;  %325 = vadd.xlane.f32.xlu1 %v324_v1  ;;  %v327_v26 = vsel %vm317_vm0, %v312_v22, 0.0  ;;  %v330_v30 = vsel %vm317_vm0, %v313_v25, 0.0  ;;  %v333_v32 = vsel %vm317_vm0, %v314_v28, 0.0  ;;  %v316_v33 = vmul.f32 %v444_v12, %v301_v29 }
 0x13e   :  { %v336_v34 = vsel %vm317_vm0, %v315_v31, 0.0 }
 0x13f   :  { %v339_v35 = vsel %vm317_vm0, %v316_v33, 0.0 }
 0x141   :  { %322 = vadd.xlane.f32.xlu0 %v321_v24  ;;  %328 = vadd.xlane.f32.xlu1 %v327_v26 }
 0x145   :  { %331 = vadd.xlane.f32.xlu0 %v330_v30  ;;  %334 = vadd.xlane.f32.xlu1 %v333_v32 }
 0x149   :  { %337 = vadd.xlane.f32.xlu0 %v336_v34  ;;  %340 = vadd.xlane.f32.xlu1 %v339_v35 }
 0x15f   :  { %349 = vperm.xlu0 %554, %v445_v36  }
 0x1ca   :  { %v320_v37 = vpop.xlane.xlu0 %319  ;;  %v326_v39 = vpop.xlane.xlu1 %325 }
 0x1ce   :  { %v323_v38 = vpop.xlane.xlu0 %322  ;;  %v329_v43 = vpop.xlane.xlu1 %328 }
 0x1d2   :  { %v332_v41 = vpop.xlane.xlu0 %331  ;;  %v335_v46 = vpop.xlane.xlu1 %334 }
 0x1d6   :  { %v338_v45 = vpop.xlane.xlu0 %337  ;;  %v341_v52 = vpop.xlane.xlu1 %340 }
 0x1de   :  { %v350_v48 = vpop.permute.xlu0 %349 }
 0x1df   :  { %v352_v2 = vadd.f32 %v350_v48, %v320_v37  ;;  %v353_v49 = vadd.f32 %v350_v48, %v323_v38  ;;  %v354_v50 = vadd.f32 %v350_v48, %v326_v39  ;;  %v355_v51 = vadd.f32 %v350_v48, %v329_v43 }
 0x1e0   :  { %v356_v53 = vadd.f32 %v350_v48, %v332_v41  ;;  %v357_v54 = vadd.f32 %v350_v48, %v335_v46  ;;  %v358_v58 = vadd.f32 %v350_v48, %v338_v45  ;;  %v359_v40 = vadd.f32 %v350_v48, %v341_v52 }
 0x1e1   :  { %v373_v55 = vrot.slane %v352_v2, %v372_v47  ;;  %v377_v56 = vrot.slane %v353_v49, %v372_v47  ;;  %v381_v57 = vrot.slane %v354_v50, %v372_v47  ;;  %v385_v59 = vrot.slane %v355_v51, %v372_v47 }
 0x1e2   :  { %v389_v42 = vrot.slane %v356_v53, %v372_v47  ;;  %v393_v62 = vrot.slane %v357_v54, %v372_v47  ;;  %v397_v0 = vrot.slane %v358_v58, %v372_v47  ;;  %v401_v4 = vrot.slane %v359_v40, %v372_v47 }
 0x1e3   :  { %v403_v60 = vsel %vm402_vm1, %v377_v56, %v373_v55 }
 0x1e4   :  { %v405_v61 = vsel %vm404_vm2, %v381_v57, %v403_v60 }
 0x1e5   :  { %v407_v63 = vsel %vm406_vm3, %v385_v59, %v405_v61 }
 0x1e6   :  { %v409_v3 = vsel %vm408_vm4, %v389_v42, %v407_v63 }
 0x1e7   :  { %v411_v5 = vsel %vm410_vm5, %v393_v62, %v409_v3 }
 0x1e8   :  { %v413_v6 = vsel %vm412_vm6, %v397_v0, %v411_v5 }
 0x1e9   :  { %v415_v7 = vsel %vm414_vm7, %v401_v4, %v413_v6 }
 0x1ea   :  { %418 = vst.msk [vmem:[%s856_s4] sm:$0xff] %vm417_vm8, %v415_v7 }

</bundles_post_ra>
